<compile_context>
chip_gen: v7x
topology: tpu7x:2x2x1
jax: 0.10.0
libtpu: 0.0.40
codegen_flags: <defaults>
</compile_context>

<pallas_src>
import functools

import jax
import jax.numpy as jnp
from jax import lax
from jax.experimental import pallas as pl
from jax.experimental.pallas import tpu as pltpu

LANES = 128      # lane width (batch elements per sublane row)
ROWS = 8         # sublane rows per inner sub-block (one f32 vreg)
TS_MAX = 1024    # max sublane rows per grid step (1024*128 elems, ~3 MiB/input)

# per-mode normalization of the final sum (before dividing by N):
#   mse:  0.1 * mean over N*3  -> 0.1/3 ;  quat: mean over N*4 -> 1/4 ;
#   stem_vector: 0.2 * mean over N -> 0.2
_MODE_COEF = {'mse': 0.1 / 3.0, 'quat': 0.25, 'stem_vector': 0.2}


# ----------------------------- kernel math ----------------------------------
def _subblock_loss(mode, p0, p1, p2, t0, t1, t2):
    """Per-element loss on an (8,128) sub-block. Zero-padded lanes give 0."""
    if mode == 'mse':
        d0 = p0 - t0
        d1 = p1 - t1
        d2 = p2 - t2
        return d0 * d0 + d1 * d1 + d2 * d2
    if mode == 'quat':
        # ||q(pred) - q(target)||^2 for unit quaternions built from RPY:
        #   = 2 - 2*[cos(dr)cos(dp)cos(dy) + sin(dr)*sin(sp)*sin(dy)]
        # with dr=(r_p-r_t)/2, dp=(p_p-p_t)/2, dy=(y_p-y_t)/2, sp=(p_p+p_t)/2.
        dr = 0.5 * (p0 - t0)
        dp = 0.5 * (p1 - t1)
        dy = 0.5 * (p2 - t2)
        sp = 0.5 * (p1 + t1)
        dot = (jnp.cos(dr) * jnp.cos(dp) * jnp.cos(dy)
               + jnp.sin(dr) * jnp.sin(sp) * jnp.sin(dy))
        return 2.0 - 2.0 * dot
    if mode == 'stem_vector':
        # <R(pred)e1, R(tgt)e1> = cos(pp)cos(pt)cos(yp-yt) + sin(pp)sin(pt)
        #   = 0.5*[cos(pp-pt)*(1+cos(dy)) + cos(pp+pt)*(cos(dy)-1)]
        dp = p1 - t1
        sp = p1 + t1
        dy = p2 - t2
        cdy = jnp.cos(dy)
        dot = 0.5 * (jnp.cos(dp) * (1.0 + cdy) + jnp.cos(sp) * (cdy - 1.0))
        return 1.0 - dot
    raise ValueError(f"unknown mode: {mode}")


def _tile_partial_sum(mode, pred_ref, tgt_ref):
    """Sum the per-element loss over a (3, ts, 128) tile into an (8,128) carry."""
    ts = pred_ref.shape[1]
    nblk = ts // ROWS

    if nblk == 1:
        return _subblock_loss(mode,
                              pred_ref[0], pred_ref[1], pred_ref[2],
                              tgt_ref[0], tgt_ref[1], tgt_ref[2])

    def body(b, acc):
        r = pl.multiple_of(b * ROWS, ROWS)
        sl = pl.ds(r, ROWS)
        per = _subblock_loss(
            mode,
            pred_ref[0, sl, :], pred_ref[1, sl, :], pred_ref[2, sl, :],
            tgt_ref[0, sl, :], tgt_ref[1, sl, :], tgt_ref[2, sl, :])
        return acc + per

    acc0 = jnp.zeros((ROWS, LANES), jnp.float32)
    return lax.fori_loop(0, nblk, body, acc0, unroll=min(nblk, 8))


# ----------------------------- Pallas kernels --------------------------------
def _angle3d_kernel_single(mode, loss_weight,
                           n_ref, pred_ref, tgt_ref, out_ref):
    """grid == 1 fast path: no scratch, no init/finalize branches."""
    partial = _tile_partial_sum(mode, pred_ref, tgt_ref)          # (8, 128)
    total = jnp.sum(partial, axis=(0, 1), keepdims=True)          # (1, 1)
    n_f = n_ref[0].astype(jnp.float32)
    out_ref[...] = (loss_weight * _MODE_COEF[mode]) * total / n_f


def _angle3d_kernel_grid(mode, loss_weight,
                         n_ref, pred_ref, tgt_ref, out_ref, acc_ref):
    """multi-step path: (8,128) accumulator across the reduction grid axis."""
    i = pl.program_id(0)

    @pl.when(i == 0)
    def _init():
        acc_ref[...] = jnp.zeros_like(acc_ref)

    acc_ref[...] += _tile_partial_sum(mode, pred_ref, tgt_ref)

    @pl.when(i == pl.num_programs(0) - 1)
    def _finalize():
        total = jnp.sum(acc_ref[...], axis=(0, 1), keepdims=True)  # (1, 1)
        n_f = n_ref[0].astype(jnp.float32)
        out_ref[...] = (loss_weight * _MODE_COEF[mode]) * total / n_f


# ------------------------------ wrapper / glue --------------------------------
def _pallas_angle3d_loss(pred, target, mode, loss_weight, _ts_max=TS_MAX):
    """pred, target: (N, 3) arrays of (roll, pitch, yaw). Returns scalar loss."""
    assert pred.shape == target.shape and pred.shape[-1] == 3
    n = int(pred.shape[0])
    assert n > 0, "Angle3DLoss requires at least one sample"

    # batch -> (sublane, lane): (N, 3) -> (3, s, 128), zero-padded.
    s_rows = -(-n // LANES)                                   # rows needed
    s_rows = max(ROWS, ((s_rows + ROWS - 1) // ROWS) * ROWS)  # sublane-aligned
    steps = -(-s_rows // _ts_max)                             # grid length
    ts = -(-s_rows // steps)
    ts = ((ts + ROWS - 1) // ROWS) * ROWS                     # tile rows (mult of 8)
    s = steps * ts
    n_pad = s * LANES

    def pack(x):
        x = x.astype(jnp.float32)
        # channel split via column slices (avoids a minor-dim-3 transpose pass)
        cols = [jnp.pad(x[:, c], (0, n_pad - n)).reshape(s, LANES)
                for c in range(3)]
        return jnp.stack(cols, axis=0)                        # (3, s, 128)

    pred_p = pack(pred)
    tgt_p = pack(target)
    n_arr = jnp.array([n], jnp.int32)                         # scalar-prefetch arg

    in_specs = [pl.BlockSpec((3, ts, LANES), lambda i, n_ref: (0, i, 0)),
                pl.BlockSpec((3, ts, LANES), lambda i, n_ref: (0, i, 0))]
    out_spec = pl.BlockSpec((1, 1), lambda i, n_ref: (0, 0))

    if steps == 1:
        kernel = functools.partial(_angle3d_kernel_single, mode, float(loss_weight))
        scratch = []
    else:
        kernel = functools.partial(_angle3d_kernel_grid, mode, float(loss_weight))
        scratch = [pltpu.VMEM((ROWS, LANES), jnp.float32)]

    out = pl.pallas_call(
        kernel,
        out_shape=jax.ShapeDtypeStruct((1, 1), jnp.float32),
        grid_spec=pltpu.PrefetchScalarGridSpec(
            num_scalar_prefetch=1,
            grid=(steps,),
            in_specs=in_specs,
            out_specs=out_spec,
            scratch_shapes=scratch,
        ),
        compiler_params=pltpu.CompilerParams(
            dimension_semantics=("arbitrary",)),
    )(n_arr, pred_p, tgt_p)
    return out[0, 0]


class Angle3DLoss:
    """JAX/Pallas port of mmdet3d Angle3DLoss (no learnable parameters)."""

    def __init__(self, mode='mse', loss_weight=1.0):
        self.mode = mode if mode in ('quat', 'stem_vector') else 'mse'
        self.loss_weight = float(loss_weight)

    def __call__(self, pred, target, weight=None):
        if weight is not None:
            # TODO(synk): per-sample `weight_reduce_loss` weighting path not
            # kernelized; kept un-traced to avoid concretizing a traced weight.
            raise NotImplementedError("weighted path not implemented")
        return _pallas_angle3d_loss(pred, target, self.mode, self.loss_weight)


# ------------------------- pure-JAX reference (check) -------------------------
def _ref_loss(pred, target, mode, loss_weight):
    pred = pred.astype(jnp.float32)
    target = target.astype(jnp.float32)
    if mode == 'quat':
        def q(rpy):
            r, p, y = rpy[:, 0] / 2, rpy[:, 1] / 2, rpy[:, 2] / 2
            qx = jnp.sin(r) * jnp.cos(p) * jnp.cos(y) - jnp.cos(r) * jnp.sin(p) * jnp.sin(y)
            qy = jnp.cos(r) * jnp.sin(p) * jnp.cos(y) + jnp.sin(r) * jnp.cos(p) * jnp.sin(y)
            qz = jnp.cos(r) * jnp.cos(p) * jnp.sin(y) - jnp.sin(r) * jnp.sin(p) * jnp.cos(y)
            qw = jnp.cos(r) * jnp.cos(p) * jnp.cos(y) + jnp.sin(r) * jnp.sin(p) * jnp.sin(y)
            return jnp.stack([qw, qx, qy, qz], axis=-1)
        loss = jnp.mean((q(pred) - q(target)) ** 2)
    elif mode == 'stem_vector':
        def rot(rpy):
            r, p, y = rpy[:, 0], rpy[:, 1], rpy[:, 2]
            o, z = jnp.ones_like(r), jnp.zeros_like(r)
            Rx = jnp.stack([o, z, z, z, jnp.cos(r), -jnp.sin(r), z, jnp.sin(r), jnp.cos(r)], -1).reshape(-1, 3, 3)
            Ry = jnp.stack([jnp.cos(p), z, jnp.sin(p), z, o, z, -jnp.sin(p), z, jnp.cos(p)], -1).reshape(-1, 3, 3)
            Rz = jnp.stack([jnp.cos(y), -jnp.sin(y), z, jnp.sin(y), jnp.cos(y), z, z, z, o], -1).reshape(-1, 3, 3)
            return Rz @ Ry @ Rx
        e1 = jnp.array([1.0, 0.0, 0.0])
        tp = rot(pred) @ e1
        tg = rot(target) @ e1
        trans = jnp.array([[0.0, 0.0, 1.0], [1.0, 0.0, 0.0], [0.0, 1.0, 0.0]])
        tp = tp @ trans.T
        tg = tg @ trans.T
        loss = jnp.mean(0.2 * (1.0 - jnp.sum(tp * tg, axis=-1)))
    else:
        loss = 0.1 * jnp.mean((pred - target) ** 2)
    return loss_weight * loss


# ---------------------------------- main --------------------------------------
if __name__ == "__main__":
    key = jax.random.PRNGKey(0)
    k1, k2, k3, k4 = jax.random.split(key, 4)

    ok = True

    # 1) typical small batch -> single-step fast path (grid == 1)
    N = 200
    pred = jax.random.uniform(k1, (N, 3), jnp.float32, minval=-jnp.pi, maxval=jnp.pi)
    target = jax.random.uniform(k2, (N, 3), jnp.float32, minval=-jnp.pi, maxval=jnp.pi)
    for mode in ('mse', 'quat', 'stem_vector'):
        loss_mod = Angle3DLoss(mode=mode, loss_weight=1.0)
        out = jax.block_until_ready(loss_mod(pred, target))
        ref = jax.block_until_ready(_ref_loss(pred, target, mode, 1.0))
        if not bool(jnp.allclose(out, ref, rtol=1e-4, atol=1e-5)):
            ok = False
            print(f"MISMATCH single mode={mode}: kernel={float(out)} ref={float(ref)}")

    # 2) force the multi-step accumulator path + inner sub-block loop
    #    (small tile override so the shapes stay tiny)
    N2 = 5000
    pred2 = jax.random.uniform(k3, (N2, 3), jnp.float32, minval=-jnp.pi, maxval=jnp.pi)
    target2 = jax.random.uniform(k4, (N2, 3), jnp.float32, minval=-jnp.pi, maxval=jnp.pi)
    for mode in ('mse', 'quat', 'stem_vector'):
        out = jax.block_until_ready(
            _pallas_angle3d_loss(pred2, target2, mode, 1.0, _ts_max=16))
        ref = jax.block_until_ready(_ref_loss(pred2, target2, mode, 1.0))
        if not bool(jnp.allclose(out, ref, rtol=1e-4, atol=1e-5)):
            ok = False
            print(f"MISMATCH grid mode={mode}: kernel={float(out)} ref={float(ref)}")

    if ok:
        print("KERNEL_OK")
</pallas_src>

<mosaic_0001>
module attributes {stable_mosaic.version = 11 : i64} {
  func.func @_angle3d_kernel_single(%arg0: i32, %arg1: memref<1xi32, #tpu.memory_space<smem>>, %arg2: memref<3x8x128xf32, #tpu.memory_space<vmem>>, %arg3: memref<3x8x128xf32, #tpu.memory_space<vmem>>, %arg4: memref<1x1xf32, #tpu.memory_space<vmem>>) attributes {dimension_semantics = [#tpu.dimension_semantics<arbitrary>], iteration_bounds = array<i64: 1>, scalar_prefetch = 1 : i64, scratch_operands = 0 : i64, tpu.core_type = #tpu.core_type<tc>, window_params = [{transform_indices = @transform_0, window_bounds = array<i64: 3, 8, 128>}, {transform_indices = @transform_1, window_bounds = array<i64: 3, 8, 128>}, {pipeline_mode = #tpu.pipeline_mode<synchronous>, transform_indices = @transform_2, window_bounds = array<i64: 1, 1>}]} {
    %c0 = arith.constant 0 : index
    %c0_0 = arith.constant 0 : index
    %c0_1 = arith.constant 0 : index
    %0 = vector.load %arg2[%c0, %c0_0, %c0_1] : memref<3x8x128xf32, #tpu.memory_space<vmem>>, vector<1x8x128xf32>
    %1 = vector.shape_cast %0 : vector<1x8x128xf32> to vector<8x128xf32>
    %c1 = arith.constant 1 : index
    %c0_2 = arith.constant 0 : index
    %c0_3 = arith.constant 0 : index
    %2 = vector.load %arg2[%c1, %c0_2, %c0_3] : memref<3x8x128xf32, #tpu.memory_space<vmem>>, vector<1x8x128xf32>
    %3 = vector.shape_cast %2 : vector<1x8x128xf32> to vector<8x128xf32>
    %c2 = arith.constant 2 : index
    %c0_4 = arith.constant 0 : index
    %c0_5 = arith.constant 0 : index
    %4 = vector.load %arg2[%c2, %c0_4, %c0_5] : memref<3x8x128xf32, #tpu.memory_space<vmem>>, vector<1x8x128xf32>
    %5 = vector.shape_cast %4 : vector<1x8x128xf32> to vector<8x128xf32>
    %c0_6 = arith.constant 0 : index
    %c0_7 = arith.constant 0 : index
    %c0_8 = arith.constant 0 : index
    %6 = vector.load %arg3[%c0_6, %c0_7, %c0_8] : memref<3x8x128xf32, #tpu.memory_space<vmem>>, vector<1x8x128xf32>
    %7 = vector.shape_cast %6 : vector<1x8x128xf32> to vector<8x128xf32>
    %c1_9 = arith.constant 1 : index
    %c0_10 = arith.constant 0 : index
    %c0_11 = arith.constant 0 : index
    %8 = vector.load %arg3[%c1_9, %c0_10, %c0_11] : memref<3x8x128xf32, #tpu.memory_space<vmem>>, vector<1x8x128xf32>
    %9 = vector.shape_cast %8 : vector<1x8x128xf32> to vector<8x128xf32>
    %c2_12 = arith.constant 2 : index
    %c0_13 = arith.constant 0 : index
    %c0_14 = arith.constant 0 : index
    %10 = vector.load %arg3[%c2_12, %c0_13, %c0_14] : memref<3x8x128xf32, #tpu.memory_space<vmem>>, vector<1x8x128xf32>
    %11 = vector.shape_cast %10 : vector<1x8x128xf32> to vector<8x128xf32>
    %12 = arith.subf %1, %7 : vector<8x128xf32>
    %13 = arith.subf %3, %9 : vector<8x128xf32>
    %14 = arith.subf %5, %11 : vector<8x128xf32>
    %15 = arith.mulf %12, %12 : vector<8x128xf32>
    %16 = arith.mulf %13, %13 : vector<8x128xf32>
    %17 = arith.addf %15, %16 : vector<8x128xf32>
    %18 = arith.mulf %14, %14 : vector<8x128xf32>
    %19 = arith.addf %17, %18 : vector<8x128xf32>
    %20 = vector.shape_cast %19 : vector<8x128xf32> to vector<1x8x128xf32>
    %cst = arith.constant dense<0.000000e+00> : vector<1xf32>
    %21 = vector.multi_reduction <add>, %20, %cst [1, 2] : vector<1x8x128xf32> to vector<1xf32>
    %22 = vector.shape_cast %21 : vector<1xf32> to vector<1x1x1xf32>
    %23 = vector.extract %22[0, 0, 0] : f32 from vector<1x1x1xf32>
    %24 = vector.broadcast %23 : f32 to vector<1x1xf32>
    %c0_15 = arith.constant 0 : index
    %25 = memref.load %arg1[%c0_15] : memref<1xi32, #tpu.memory_space<smem>>
    %26 = arith.sitofp %25 : i32 to f32
    %cst_16 = arith.constant 0.0333333351 : f32
    %27 = vector.broadcast %cst_16 : f32 to vector<1x1xf32>
    %28 = arith.mulf %27, %24 : vector<1x1xf32>
    %29 = vector.broadcast %26 : f32 to vector<1x1xf32>
    %30 = arith.divf %28, %29 : vector<1x1xf32>
    %c0_17 = arith.constant 0 : index
    %c0_18 = arith.constant 0 : index
    %31 = vector.load %arg4[%c0_17, %c0_18] : memref<1x1xf32, #tpu.memory_space<vmem>>, vector<1x1xf32>
    tpu.vector_store %arg4[%c0_17, %c0_18], %30 {strides = array<i32>} : memref<1x1xf32, #tpu.memory_space<vmem>>, vector<1x1xf32>,
    return
  }
  func.func @transform_0(%arg0: i32, %arg1: memref<1xi32, #tpu.memory_space<smem>>) -> (i32, i32, i32) {
    %c0_i32 = arith.constant 0 : i32
    %c0_i32_0 = arith.constant 0 : i32
    %c0_i32_1 = arith.constant 0 : i32
    return %c0_i32, %arg0, %c0_i32_0 : i32, i32, i32
  }
  func.func @transform_1(%arg0: i32, %arg1: memref<1xi32, #tpu.memory_space<smem>>) -> (i32, i32, i32) {
    %c0_i32 = arith.constant 0 : i32
    %c0_i32_0 = arith.constant 0 : i32
    %c0_i32_1 = arith.constant 0 : i32
    return %c0_i32, %arg0, %c0_i32_0 : i32, i32, i32
  }
  func.func @transform_2(%arg0: i32, %arg1: memref<1xi32, #tpu.memory_space<smem>>) -> (i32, i32) {
    %c0_i32 = arith.constant 0 : i32
    %c0_i32_0 = arith.constant 0 : i32
    %c0_i32_1 = arith.constant 0 : i32
    return %c0_i32, %c0_i32_0 : i32, i32
  }
}

</mosaic_0001>

<bundles_post_ra>
// kernel: tpu_custom_call.1
= control target key start
LH: loop header
LB: loop body
LE: loop exit
PB: predicated region body
PF: predicated region fallthrough
CT: control target
= control target key end

     0   :  { %9 = vsyncpa [#allocation5], 0  ;;  %s239_s0 = inlined_call_operand.<no memory space> [shape: s32[1], index: 0, kind: input, shape index: {}]   ;;  %s240_s1 = inlined_call_operand.hbm [shape: f32[3,8,128], index: 1, kind: input, shape index: {}]   ;;  %s241_s2 = inlined_call_operand.hbm [shape: f32[3,8,128], index: 2, kind: input, shape index: {}]   ;;  %s242_s3 = inlined_call_operand.hbm [shape: f32[1,1], index: 3, kind: output, shape index: {}]  }
   0x1   :  { %10 = vsyncpa [#allocation8], 0 }
   0x2   :  { %11 = vsyncpa [#allocation6], 0  ;;  %s175_s12 = smov [#allocation4]   ;;  %s103_s16 = scalar_lea.hbm %s240_s1, 384 }
   0x3   :  { %s17_s13 = sshll.u32 %s175_s12, 4  ;;  %p104_p0 = scmp.ne.s32.totalorder %s240_s1, %s103_s16  ;;  %s18_s13 = int_to_ptr.vmem [resolvable:$true] %s17_s13 }
   0x4   :  { %p107_p1 = scmp.lt.u32.totalorder %s103_s16, %s240_s1 }
   0x6   :  { %p109_p2 = pnand %p107_p1, %p104_p0 }
   0x8   :  { %112 = shalt.err (!%p109_p2)
}
   0x9   :  { %s113_s21 = scalar_lea.vmem %s18_s13, 384  ;;  %p118_p4 = scmp.lt.s32.totalorder %s18_s13, %s18_s13 }
   0xa   :  { %p114_p3 = scmp.ne.s32.totalorder %s18_s13, %s113_s21  ;;  %p119_p5 = scmp.lt.s32.totalorder %s113_s21, %s113_s21 }
   0xc   :  { %p120_p6 = por %p119_p5, %p118_p4 }
   0xe   :  { %p121_p7 = pnand %p120_p6, %p114_p3 }
  0x10   :  { %124 = shalt.err (!%p121_p7)
}
  0x11   :  { %s176_s22 = smov 128   ;;  %s177_s23 = smov 8  }
  0x12   :  { %23 = dma.hbm_to_vmem [thread:$0]  %s240_s1, 384, %s18_s13, [#allocation5], %s176_s22, %s176_s22, %s177_s23  }
  0x13   :  { %s178_s26 = smov [#allocation7]   ;;  %s125_s30 = scalar_lea.hbm %s241_s2, 384 }
  0x14   :  { %s29_s27 = sshll.u32 %s178_s26, 4  ;;  %p126_p8 = scmp.ne.s32.totalorder %s241_s2, %s125_s30  ;;  %s30_s27 = int_to_ptr.vmem [resolvable:$true] %s29_s27 }
  0x15   :  { %p129_p9 = scmp.lt.u32.totalorder %s125_s30, %s241_s2 }
  0x17   :  { %p131_p10 = pnand %p129_p9, %p126_p8 }
  0x19   :  { %134 = shalt.err (!%p131_p10)
}
  0x1a   :  { %s135_s8 = scalar_lea.vmem %s30_s27, 384  ;;  %p140_p12 = scmp.lt.s32.totalorder %s30_s27, %s30_s27 }
  0x1b   :  { %p136_p11 = scmp.ne.s32.totalorder %s30_s27, %s135_s8  ;;  %p141_p13 = scmp.lt.s32.totalorder %s135_s8, %s135_s8 }
  0x1d   :  { %p142_p0 = por %p141_p13, %p140_p12 }
  0x1f   :  { %p143_p1 = pnand %p142_p0, %p136_p11 }
  0x21   :  { %146 = shalt.err (!%p143_p1)
}
  0x22   :  { %35 = dma.hbm_to_vmem [thread:$0]  %s241_s2, 384, %s30_s27, [#allocation8], %s176_s22, %s176_s22, %s177_s23  }
  0x23   :  { %169 = dma.done.wait [#allocation5], 384  }
  0x24   :  { %170 = vsyncadd [#allocation5], 4294966912 }
  0x25   :  { %171 = dma.done.wait [#allocation8], 384  }
  0x26   :  { %172 = vsyncadd [#allocation8], 4294966912  ;;  %v42_v0 = vld [vmem:[#allocation4] sm:$0xff]  ;;  %v44_v1 = vld [vmem:[#allocation4 + $0x8] sm:$0xff]  ;;  %s71_s11 = scvt.s32.f32 %s239_s0  ;;  %s179_s13 = smov [#allocation9]   ;;  %vm76_vm0 = vcmask 0  }
  0x27   :  { %v46_v2 = vld [vmem:[#allocation4 + $0x10] sm:$0xff]  ;;  %v47_v3 = vld [vmem:[#allocation7] sm:$0xff]  ;;  %v49_v4 = vld [vmem:[#allocation7 + $0x8] sm:$0xff]  ;;  %s84_s14 = sshll.u32 %s179_s13, 4  ;;  %s85_s14 = int_to_ptr.vmem [resolvable:$true] %s84_s14 }
  0x28   :  { %v51_v5 = vld [vmem:[#allocation7 + $0x10] sm:$0xff]  ;;  %v52_v6 = vsub.f32 %v42_v0, %v47_v3  ;;  %v53_v7 = vsub.f32 %v44_v1, %v49_v4  ;;  %v73_v21 = vstv %s71_s11  ;;  %s147_s15 = scalar_lea.vmem %s85_s14, 16  ;;  %s151_s16 = scalar_lea.vmem %s85_s14, 32 }
  0x29   :  { %v54_v8 = vsub.f32 %v46_v2, %v51_v5  ;;  %101 = vrcp.f32 %v73_v21  ;;  %p148_p2 = scmp.ne.s32.totalorder %s85_s14, %s147_s15  ;;  %p152_p3 = scmp.lt.s32.totalorder %s85_s14, %s85_s14 }
  0x2a   :  { %v55_v9 = vmul.f32 %v52_v6, %v52_v6  ;;  %v56_v10 = vmul.f32 %v53_v7, %v53_v7  ;;  %p153_p4 = scmp.lt.s32.totalorder %s151_s16, %s147_s15 }
  0x2b   :  { %v58_v11 = vmul.f32 %v54_v8, %v54_v8 }
  0x2c   :  { %v57_v12 = vadd.f32 %v56_v10, %v55_v9  ;;  %p154_p5 = por %p153_p4, %p152_p3 }
  0x2e   :  { %v59_v13 = vadd.f32 %v58_v11, %v57_v12  ;;  %p155_p6 = pnand %p154_p5, %p148_p2 }
  0x30   :  { %60 = vadd.xlane.f32.xlu0 %v59_v13 }
  0x33   :  { %v102_v22 = vpop.eup %101 }
  0xbd   :  { %v61_v14 = vpop.xlane.xlu0 %60 }
  0xbe   :  { %v62_v15 = vrot.slane %v61_v14, 4 }
  0xc0   :  { %v63_v16 = vadd.f32 %v62_v15, %v61_v14 }
  0xc2   :  { %v64_v17 = vrot.slane %v63_v16, 2 }
  0xc4   :  { %v65_v18 = vadd.f32 %v64_v17, %v63_v16 }
  0xc6   :  { %v66_v19 = vrot.slane %v65_v18, 1 }
  0xc8   :  { %v67_v20 = vadd.f32 %v66_v19, %v65_v18 }
  0xca   :  { %94 = vpush %v67_v20 }
  0xfb   :  { %s95_s12 = spop %94 }
  0xfc   :  { %v69_v23 = vstv %s95_s12 }
  0xfd   :  { %v72_v24 = vmul.f32 0.033333335, %v69_v23 }
  0xff   :  { %v75_v25 = vmul.f32 %v102_v22, %v72_v24 }
 0x101   :  { %77 = vst.msk [vmem:[#allocation9] sm:$0x1] %vm76_vm0, %v75_v25 }
 0x102   :  { %158 = shalt.err (!%p155_p6)
}
 0x103   :  { %s159_s18 = scalar_lea.hbm %s242_s3, 16 }
 0x104   :  { %p160_p7 = scmp.ne.s32.totalorder %s242_s3, %s159_s18  ;;  %p163_p8 = scmp.lt.u32.totalorder %s159_s18, %s242_s3 }
 0x106   :  { %p165_p9 = pnand %p163_p8, %p160_p7 }
 0x108   :  { %168 = shalt.err (!%p165_p9)
}
 0x109   :  { %87 = dma.vmem_to_hbm [thread:$0]  %s85_s14, 16, %s242_s3, [#allocation6]  }
 0x10a   :  { %173 = dma.done.wait [#allocation6], 16  }
 0x10b   :  { %174 = vsyncadd [#allocation6], 4294967280 }
 0x10c   :  { %91 = vsyncpa [#allocation5], 1 }
 0x10d   :  { %92 = vsyncpa [#allocation8], 1 }
 0x10e   :  { %93 = vsyncpa [#allocation6], 1 }

</bundles_post_ra>
